<compile_context>
chip_gen: v6e
topology: v6e:2x2x1
jax: 0.10.0
libtpu: 0.0.40
codegen_flags: <defaults>
</compile_context>

<pallas_src>
import numpy as np
import jax
import jax.numpy as jnp
from jax import lax
from jax.experimental import pallas as pl
from jax.experimental.pallas import tpu as pltpu


def _metrics_kernel(out_r_ref, prob_r_ref, prob_c_ref, tar_r_ref, tar_c_ref, res_ref):
    # One grid step == one task column.
    #   out_r_ref / prob_r_ref / tar_r_ref : (1, N)  samples on the lane axis
    #   prob_c_ref / tar_c_ref             : (N, 1)  samples on the sublane axis
    #   res_ref                            : (1, 128)
    #     lanes: 0=acc 1=f1 2=pre 3=rec 4=auc 5=auc_valid, rest zero
    out_r = out_r_ref[...]     # (1, N)
    prob_r = prob_r_ref[...]   # (1, N)
    prob_c = prob_c_ref[...]   # (N, 1)
    tar_r = tar_r_ref[...]     # (1, N)
    tar_c = tar_c_ref[...]     # (N, 1)
    n = jnp.float32(out_r.shape[1])

    # ---- accuracy + confusion-matrix counts (lane-axis reductions over samples) ----
    correct = jnp.sum((out_r == tar_r).astype(jnp.float32), axis=1, keepdims=True)  # (1,1)
    acc = correct / n
    tp = jnp.sum(out_r * tar_r, axis=1, keepdims=True)
    fp = jnp.sum(out_r * (1.0 - tar_r), axis=1, keepdims=True)
    fn = jnp.sum((1.0 - out_r) * tar_r, axis=1, keepdims=True)

    pre_den = tp + fp
    pre = jnp.where(pre_den > 0.0, tp / jnp.where(pre_den > 0.0, pre_den, 1.0), 0.0)
    rec_den = tp + fn
    rec = jnp.where(rec_den > 0.0, tp / jnp.where(rec_den > 0.0, rec_den, 1.0), 0.0)
    f1_den = pre + rec
    f1 = jnp.where(f1_den > 0.0,
                   2.0 * pre * rec / jnp.where(f1_den > 0.0, f1_den, 1.0),
                   0.0)

    # ---- ROC-AUC via pairwise Mann-Whitney U, fully vectorised ----------------------
    # cmp[i, j] = 1 if p_i > p_j, 0.5 if p_i == p_j, 0 otherwise
    # U = sum_{i pos, j neg} cmp[i, j]
    n_pos = jnp.sum(tar_r, axis=1, keepdims=True)              # (1,1)
    n_neg = n - n_pos

    gt = (prob_c > prob_r).astype(jnp.float32)                 # (N, N) lane-dense tile
    eq = (prob_c == prob_r).astype(jnp.float32)
    cmpm = gt + 0.5 * eq
    # mask negative j samples (lanes) and positive i samples (sublanes), then reduce
    w = cmpm * (1.0 - tar_r)                                   # (N, N)
    row_u = jnp.sum(w, axis=1, keepdims=True)                  # (N, 1)
    u = jnp.sum(tar_c * row_u, axis=0, keepdims=True)          # (1, 1)

    auc_valid = jnp.logical_and(n_pos > 0.0, n_neg > 0.0)
    auc_den = n_pos * n_neg
    auc = jnp.where(auc_valid, u / jnp.where(auc_valid, auc_den, 1.0), 0.0)

    # ---- single coalesced, lane-dense output store ----------------------------------
    lane = lax.broadcasted_iota(jnp.int32, (1, 128), 1)
    zero = jnp.zeros((1, 128), jnp.float32)
    row = (jnp.where(lane == 0, acc, zero)
           + jnp.where(lane == 1, f1, zero)
           + jnp.where(lane == 2, pre, zero)
           + jnp.where(lane == 3, rec, zero)
           + jnp.where(lane == 4, auc, zero)
           + jnp.where(lane == 5, auc_valid.astype(jnp.float32), zero))
    res_ref[...] = row


def metrics_c_pallas(out, prob, tar):
    """Mirrors metrics_c.forward(out, prob, tar)."""
    squeeze = (out.ndim == 1)
    if squeeze:
        out, prob, tar = out[:, None], prob[:, None], tar[:, None]

    out = out.astype(jnp.float32)
    prob = prob.astype(jnp.float32)
    tar = tar.astype(jnp.float32)
    N, T = out.shape

    # Lane-dense layouts built once in XLA: per task both a (1, N) row view and an
    # (N, 1) column view so the kernel forms the pairwise tile without transposes.
    out_t = jnp.transpose(out)      # (T, N)
    prob_t = jnp.transpose(prob)
    tar_t = jnp.transpose(tar)
    out_rows = out_t[:, None, :]    # (T, 1, N)
    prob_rows = prob_t[:, None, :]
    tar_rows = tar_t[:, None, :]
    prob_cols = prob_t[:, :, None]  # (T, N, 1)
    tar_cols = tar_t[:, :, None]

    row_spec = pl.BlockSpec((None, 1, N), lambda t: (t, 0, 0))
    col_spec = pl.BlockSpec((None, N, 1), lambda t: (t, 0, 0))

    flops = int(T) * (7 * N * N + 12 * N)            # pairwise AUC + count reductions
    bytes_accessed = (5 * N * T + 128 * T) * 4

    res = pl.pallas_call(
        _metrics_kernel,
        out_shape=jax.ShapeDtypeStruct((T, 1, 128), jnp.float32),
        grid=(T,),
        in_specs=[row_spec, row_spec, col_spec, row_spec, col_spec],
        out_specs=pl.BlockSpec((None, 1, 128), lambda t: (t, 0, 0)),
        compiler_params=pltpu.CompilerParams(dimension_semantics=("parallel",)),
        cost_estimate=pl.CostEstimate(flops=flops, transcendentals=0,
                                      bytes_accessed=bytes_accessed),
    )(out_rows, prob_rows, prob_cols, tar_rows, tar_cols)

    res = res[:, 0, :]                               # (T, 128)
    acc, f1, pre, rec, auc, valid = (res[:, 0], res[:, 1], res[:, 2],
                                     res[:, 3], res[:, 4], res[:, 5])

    if squeeze:
        return acc[0], f1[0], pre[0], rec[0], auc[0]

    # Column means; AUC averaged only over columns where it was computable
    # (reproduces the try/except skip in the torch forward).
    # Note: if NO column has both classes, this returns 0 instead of NaN.
    vsum = jnp.maximum(jnp.sum(valid), 1.0)
    return (jnp.mean(acc), jnp.mean(f1), jnp.mean(pre), jnp.mean(rec),
            jnp.sum(auc * valid) / vsum)


# ---------------------------------------------------------------------------
# pure-numpy reference (same semantics as sklearn metrics for binary labels)
# ---------------------------------------------------------------------------
def _ref_metrics(out, prob, tar):
    accs, f1s, pres, recs, aucs = [], [], [], [], []
    for i in range(out.shape[1]):
        o, p, t = out[:, i], prob[:, i], tar[:, i]
        accs.append(np.mean(o == t))
        tp = np.sum((o == 1) & (t == 1))
        fp = np.sum((o == 1) & (t == 0))
        fn = np.sum((o == 0) & (t == 1))
        pre = tp / (tp + fp) if tp + fp > 0 else 0.0
        rec = tp / (tp + fn) if tp + fn > 0 else 0.0
        f1 = 2 * pre * rec / (pre + rec) if pre + rec > 0 else 0.0
        pres.append(pre); recs.append(rec); f1s.append(f1)
        npos, nneg = int(np.sum(t == 1)), int(np.sum(t == 0))
        if npos > 0 and nneg > 0:
            u = 0.0
            for a in range(len(p)):
                if t[a] != 1:
                    continue
                for b in range(len(p)):
                    if t[b] != 0:
                        continue
                    u += 1.0 if p[a] > p[b] else (0.5 if p[a] == p[b] else 0.0)
            aucs.append(u / (npos * nneg))
    return (np.mean(accs), np.mean(f1s), np.mean(pres), np.mean(recs), np.mean(aucs))


if __name__ == "__main__":
    N, T = 16, 4  # batch of 16 molecules, 4 binary tasks
    key = jax.random.PRNGKey(0)
    k1, k2, k3 = jax.random.split(key, 3)

    prob = jax.random.uniform(k1, (N, T), dtype=jnp.float32)          # probabilities
    out = (jax.random.uniform(k2, (N, T)) > 0.5).astype(jnp.float32)  # predicted labels
    tar = (jax.random.uniform(k3, (N, T)) > 0.5).astype(jnp.float32)  # true labels

    result = metrics_c_pallas(out, prob, tar)
    result = jax.block_until_ready(result)

    ref = _ref_metrics(np.asarray(out), np.asarray(prob), np.asarray(tar))
    got = tuple(float(r) for r in result)
    np.testing.assert_allclose(got, ref, rtol=1e-5, atol=1e-6)

    print("KERNEL_OK")
</pallas_src>

<mosaic_0001>
module attributes {stable_mosaic.version = 11 : i64} {
  func.func @_metrics_kernel(%arg0: i32, %arg1: memref<1x1x16xf32, #tpu.memory_space<vmem>>, %arg2: memref<1x1x16xf32, #tpu.memory_space<vmem>>, %arg3: memref<1x16x1xf32, #tpu.memory_space<vmem>>, %arg4: memref<1x1x16xf32, #tpu.memory_space<vmem>>, %arg5: memref<1x16x1xf32, #tpu.memory_space<vmem>>, %arg6: memref<1x1x128xf32, #tpu.memory_space<vmem>>) attributes {dimension_semantics = [#tpu.dimension_semantics<parallel>], iteration_bounds = array<i64: 4>, scalar_prefetch = 0 : i64, scratch_operands = 0 : i64, tpu.core_type = #tpu.core_type<tc>, window_params = [{transform_indices = @transform_0, window_bounds = array<i64: 1, 1, 16>}, {transform_indices = @transform_1, window_bounds = array<i64: 1, 1, 16>}, {transform_indices = @transform_2, window_bounds = array<i64: 1, 16, 1>}, {transform_indices = @transform_3, window_bounds = array<i64: 1, 1, 16>}, {transform_indices = @transform_4, window_bounds = array<i64: 1, 16, 1>}, {transform_indices = @transform_5, window_bounds = array<i64: 1, 1, 128>}]} {
    %c0 = arith.constant 0 : index
    %c0_0 = arith.constant 0 : index
    %c0_1 = arith.constant 0 : index
    %0 = vector.load %arg1[%c0, %c0_0, %c0_1] : memref<1x1x16xf32, #tpu.memory_space<vmem>>, vector<1x1x16xf32>
    %1 = vector.shape_cast %0 : vector<1x1x16xf32> to vector<1x16xf32>
    %c0_2 = arith.constant 0 : index
    %c0_3 = arith.constant 0 : index
    %c0_4 = arith.constant 0 : index
    %2 = vector.load %arg2[%c0_2, %c0_3, %c0_4] : memref<1x1x16xf32, #tpu.memory_space<vmem>>, vector<1x1x16xf32>
    %3 = vector.shape_cast %2 : vector<1x1x16xf32> to vector<1x16xf32>
    %c0_5 = arith.constant 0 : index
    %c0_6 = arith.constant 0 : index
    %c0_7 = arith.constant 0 : index
    %4 = vector.load %arg3[%c0_5, %c0_6, %c0_7] : memref<1x16x1xf32, #tpu.memory_space<vmem>>, vector<1x16x1xf32>
    %5 = vector.shape_cast %4 : vector<1x16x1xf32> to vector<16x1xf32>
    %c0_8 = arith.constant 0 : index
    %c0_9 = arith.constant 0 : index
    %c0_10 = arith.constant 0 : index
    %6 = vector.load %arg4[%c0_8, %c0_9, %c0_10] : memref<1x1x16xf32, #tpu.memory_space<vmem>>, vector<1x1x16xf32>
    %7 = vector.shape_cast %6 : vector<1x1x16xf32> to vector<1x16xf32>
    %c0_11 = arith.constant 0 : index
    %c0_12 = arith.constant 0 : index
    %c0_13 = arith.constant 0 : index
    %8 = vector.load %arg5[%c0_11, %c0_12, %c0_13] : memref<1x16x1xf32, #tpu.memory_space<vmem>>, vector<1x16x1xf32>
    %9 = vector.shape_cast %8 : vector<1x16x1xf32> to vector<16x1xf32>
    %10 = arith.cmpf oeq, %1, %7 : vector<1x16xf32>
    %11 = arith.extui %10 : vector<1x16xi1> to vector<1x16xi32>
    %12 = arith.sitofp %11 : vector<1x16xi32> to vector<1x16xf32>
    %cst = arith.constant dense<0.000000e+00> : vector<1xf32>
    %13 = vector.multi_reduction <add>, %12, %cst [1] : vector<1x16xf32> to vector<1xf32>
    %14 = vector.shape_cast %13 : vector<1xf32> to vector<1x1xf32>
    %cst_14 = arith.constant 1.600000e+01 : f32
    %15 = vector.broadcast %cst_14 : f32 to vector<1x1xf32>
    %16 = arith.divf %14, %15 : vector<1x1xf32>
    %17 = arith.mulf %1, %7 : vector<1x16xf32>
    %cst_15 = arith.constant dense<0.000000e+00> : vector<1xf32>
    %18 = vector.multi_reduction <add>, %17, %cst_15 [1] : vector<1x16xf32> to vector<1xf32>
    %19 = vector.shape_cast %18 : vector<1xf32> to vector<1x1xf32>
    %cst_16 = arith.constant 1.000000e+00 : f32
    %20 = vector.broadcast %cst_16 : f32 to vector<1x16xf32>
    %21 = arith.subf %20, %7 : vector<1x16xf32>
    %22 = arith.mulf %1, %21 : vector<1x16xf32>
    %cst_17 = arith.constant dense<0.000000e+00> : vector<1xf32>
    %23 = vector.multi_reduction <add>, %22, %cst_17 [1] : vector<1x16xf32> to vector<1xf32>
    %24 = vector.shape_cast %23 : vector<1xf32> to vector<1x1xf32>
    %cst_18 = arith.constant 1.000000e+00 : f32
    %25 = vector.broadcast %cst_18 : f32 to vector<1x16xf32>
    %26 = arith.subf %25, %1 : vector<1x16xf32>
    %27 = arith.mulf %26, %7 : vector<1x16xf32>
    %cst_19 = arith.constant dense<0.000000e+00> : vector<1xf32>
    %28 = vector.multi_reduction <add>, %27, %cst_19 [1] : vector<1x16xf32> to vector<1xf32>
    %29 = vector.shape_cast %28 : vector<1xf32> to vector<1x1xf32>
    %30 = arith.addf %19, %24 : vector<1x1xf32>
    %cst_20 = arith.constant 0.000000e+00 : f32
    %31 = vector.broadcast %cst_20 : f32 to vector<1x1xf32>
    %32 = arith.cmpf ogt, %30, %31 : vector<1x1xf32>
    %cst_21 = arith.constant 0.000000e+00 : f32
    %33 = vector.broadcast %cst_21 : f32 to vector<1x1xf32>
    %34 = arith.cmpf ogt, %30, %33 : vector<1x1xf32>
    %cst_22 = arith.constant 1.000000e+00 : f32
    %35 = vector.broadcast %cst_22 : f32 to vector<1x1xf32>
    %36 = arith.select %34, %30, %35 : vector<1x1xi1>, vector<1x1xf32>
    %37 = arith.divf %19, %36 : vector<1x1xf32>
    %cst_23 = arith.constant 0.000000e+00 : f32
    %38 = vector.broadcast %cst_23 : f32 to vector<1x1xf32>
    %39 = arith.select %32, %37, %38 : vector<1x1xi1>, vector<1x1xf32>
    %40 = arith.addf %19, %29 : vector<1x1xf32>
    %cst_24 = arith.constant 0.000000e+00 : f32
    %41 = vector.broadcast %cst_24 : f32 to vector<1x1xf32>
    %42 = arith.cmpf ogt, %40, %41 : vector<1x1xf32>
    %cst_25 = arith.constant 0.000000e+00 : f32
    %43 = vector.broadcast %cst_25 : f32 to vector<1x1xf32>
    %44 = arith.cmpf ogt, %40, %43 : vector<1x1xf32>
    %cst_26 = arith.constant 1.000000e+00 : f32
    %45 = vector.broadcast %cst_26 : f32 to vector<1x1xf32>
    %46 = arith.select %44, %40, %45 : vector<1x1xi1>, vector<1x1xf32>
    %47 = arith.divf %19, %46 : vector<1x1xf32>
    %cst_27 = arith.constant 0.000000e+00 : f32
    %48 = vector.broadcast %cst_27 : f32 to vector<1x1xf32>
    %49 = arith.select %42, %47, %48 : vector<1x1xi1>, vector<1x1xf32>
    %50 = arith.addf %39, %49 : vector<1x1xf32>
    %cst_28 = arith.constant 0.000000e+00 : f32
    %51 = vector.broadcast %cst_28 : f32 to vector<1x1xf32>
    %52 = arith.cmpf ogt, %50, %51 : vector<1x1xf32>
    %cst_29 = arith.constant 2.000000e+00 : f32
    %53 = vector.broadcast %cst_29 : f32 to vector<1x1xf32>
    %54 = arith.mulf %53, %39 : vector<1x1xf32>
    %55 = arith.mulf %54, %49 : vector<1x1xf32>
    %cst_30 = arith.constant 0.000000e+00 : f32
    %56 = vector.broadcast %cst_30 : f32 to vector<1x1xf32>
    %57 = arith.cmpf ogt, %50, %56 : vector<1x1xf32>
    %cst_31 = arith.constant 1.000000e+00 : f32
    %58 = vector.broadcast %cst_31 : f32 to vector<1x1xf32>
    %59 = arith.select %57, %50, %58 : vector<1x1xi1>, vector<1x1xf32>
    %60 = arith.divf %55, %59 : vector<1x1xf32>
    %cst_32 = arith.constant 0.000000e+00 : f32
    %61 = vector.broadcast %cst_32 : f32 to vector<1x1xf32>
    %62 = arith.select %52, %60, %61 : vector<1x1xi1>, vector<1x1xf32>
    %cst_33 = arith.constant dense<0.000000e+00> : vector<1xf32>
    %63 = vector.multi_reduction <add>, %7, %cst_33 [1] : vector<1x16xf32> to vector<1xf32>
    %64 = vector.shape_cast %63 : vector<1xf32> to vector<1x1xf32>
    %cst_34 = arith.constant 1.600000e+01 : f32
    %65 = vector.broadcast %cst_34 : f32 to vector<1x1xf32>
    %66 = arith.subf %65, %64 : vector<1x1xf32>
    %67 = vector.broadcast %5 : vector<16x1xf32> to vector<16x16xf32>
    %68 = vector.broadcast %3 : vector<1x16xf32> to vector<16x16xf32>
    %69 = arith.cmpf ogt, %67, %68 : vector<16x16xf32>
    %70 = arith.extui %69 : vector<16x16xi1> to vector<16x16xi32>
    %71 = arith.sitofp %70 : vector<16x16xi32> to vector<16x16xf32>
    %72 = vector.broadcast %5 : vector<16x1xf32> to vector<16x16xf32>
    %73 = vector.broadcast %3 : vector<1x16xf32> to vector<16x16xf32>
    %74 = arith.cmpf oeq, %72, %73 : vector<16x16xf32>
    %75 = arith.extui %74 : vector<16x16xi1> to vector<16x16xi32>
    %76 = arith.sitofp %75 : vector<16x16xi32> to vector<16x16xf32>
    %cst_35 = arith.constant 5.000000e-01 : f32
    %77 = vector.broadcast %cst_35 : f32 to vector<16x16xf32>
    %78 = arith.mulf %77, %76 : vector<16x16xf32>
    %79 = arith.addf %71, %78 : vector<16x16xf32>
    %cst_36 = arith.constant 1.000000e+00 : f32
    %80 = vector.broadcast %cst_36 : f32 to vector<1x16xf32>
    %81 = arith.subf %80, %7 : vector<1x16xf32>
    %82 = vector.broadcast %81 : vector<1x16xf32> to vector<16x16xf32>
    %83 = arith.mulf %79, %82 : vector<16x16xf32>
    %cst_37 = arith.constant dense<0.000000e+00> : vector<16xf32>
    %84 = vector.multi_reduction <add>, %83, %cst_37 [1] : vector<16x16xf32> to vector<16xf32>
    %85 = vector.shape_cast %84 : vector<16xf32> to vector<16x1xf32>
    %86 = arith.mulf %9, %85 : vector<16x1xf32>
    %cst_38 = arith.constant dense<0.000000e+00> : vector<1xf32>
    %87 = vector.multi_reduction <add>, %86, %cst_38 [0] : vector<16x1xf32> to vector<1xf32>
    %88 = vector.shape_cast %87 : vector<1xf32> to vector<1x1xf32>
    %cst_39 = arith.constant 0.000000e+00 : f32
    %89 = vector.broadcast %cst_39 : f32 to vector<1x1xf32>
    %90 = arith.cmpf ogt, %64, %89 : vector<1x1xf32>
    %cst_40 = arith.constant 0.000000e+00 : f32
    %91 = vector.broadcast %cst_40 : f32 to vector<1x1xf32>
    %92 = arith.cmpf ogt, %66, %91 : vector<1x1xf32>
    %93 = arith.andi %90, %92 : vector<1x1xi1>
    %94 = arith.mulf %64, %66 : vector<1x1xf32>
    %cst_41 = arith.constant 1.000000e+00 : f32
    %95 = vector.broadcast %cst_41 : f32 to vector<1x1xf32>
    %96 = arith.select %93, %94, %95 : vector<1x1xi1>, vector<1x1xf32>
    %97 = arith.divf %88, %96 : vector<1x1xf32>
    %cst_42 = arith.constant 0.000000e+00 : f32
    %98 = vector.broadcast %cst_42 : f32 to vector<1x1xf32>
    %99 = arith.select %93, %97, %98 : vector<1x1xi1>, vector<1x1xf32>
    %100 = tpu.iota {dimensions = array<i32: 1>} : vector<1x128xi32>
    %cst_43 = arith.constant 0.000000e+00 : f32
    %101 = vector.broadcast %cst_43 : f32 to vector<1x128xf32>
    %c0_i32 = arith.constant 0 : i32
    %102 = vector.broadcast %c0_i32 : i32 to vector<1x128xi32>
    %103 = arith.cmpi eq, %100, %102 : vector<1x128xi32>
    %104 = vector.shape_cast %16 : vector<1x1xf32> to vector<1x1xf32>
    %105 = vector.broadcast %104 : vector<1x1xf32> to vector<1x128xf32>
    %106 = arith.select %103, %105, %101 : vector<1x128xi1>, vector<1x128xf32>
    %c1_i32 = arith.constant 1 : i32
    %107 = vector.broadcast %c1_i32 : i32 to vector<1x128xi32>
    %108 = arith.cmpi eq, %100, %107 : vector<1x128xi32>
    %109 = vector.shape_cast %62 : vector<1x1xf32> to vector<1x1xf32>
    %110 = vector.broadcast %109 : vector<1x1xf32> to vector<1x128xf32>
    %111 = arith.select %108, %110, %101 : vector<1x128xi1>, vector<1x128xf32>
    %112 = arith.addf %106, %111 : vector<1x128xf32>
    %c2_i32 = arith.constant 2 : i32
    %113 = vector.broadcast %c2_i32 : i32 to vector<1x128xi32>
    %114 = arith.cmpi eq, %100, %113 : vector<1x128xi32>
    %115 = vector.shape_cast %39 : vector<1x1xf32> to vector<1x1xf32>
    %116 = vector.broadcast %115 : vector<1x1xf32> to vector<1x128xf32>
    %117 = arith.select %114, %116, %101 : vector<1x128xi1>, vector<1x128xf32>
    %118 = arith.addf %112, %117 : vector<1x128xf32>
    %c3_i32 = arith.constant 3 : i32
    %119 = vector.broadcast %c3_i32 : i32 to vector<1x128xi32>
    %120 = arith.cmpi eq, %100, %119 : vector<1x128xi32>
    %121 = vector.shape_cast %49 : vector<1x1xf32> to vector<1x1xf32>
    %122 = vector.broadcast %121 : vector<1x1xf32> to vector<1x128xf32>
    %123 = arith.select %120, %122, %101 : vector<1x128xi1>, vector<1x128xf32>
    %124 = arith.addf %118, %123 : vector<1x128xf32>
    %c4_i32 = arith.constant 4 : i32
    %125 = vector.broadcast %c4_i32 : i32 to vector<1x128xi32>
    %126 = arith.cmpi eq, %100, %125 : vector<1x128xi32>
    %127 = vector.shape_cast %99 : vector<1x1xf32> to vector<1x1xf32>
    %128 = vector.broadcast %127 : vector<1x1xf32> to vector<1x128xf32>
    %129 = arith.select %126, %128, %101 : vector<1x128xi1>, vector<1x128xf32>
    %130 = arith.addf %124, %129 : vector<1x128xf32>
    %c5_i32 = arith.constant 5 : i32
    %131 = vector.broadcast %c5_i32 : i32 to vector<1x128xi32>
    %132 = arith.cmpi eq, %100, %131 : vector<1x128xi32>
    %133 = arith.extui %93 : vector<1x1xi1> to vector<1x1xi32>
    %134 = arith.sitofp %133 : vector<1x1xi32> to vector<1x1xf32>
    %135 = vector.shape_cast %134 : vector<1x1xf32> to vector<1x1xf32>
    %136 = vector.broadcast %135 : vector<1x1xf32> to vector<1x128xf32>
    %137 = arith.select %132, %136, %101 : vector<1x128xi1>, vector<1x128xf32>
    %138 = arith.addf %130, %137 : vector<1x128xf32>
    %c0_44 = arith.constant 0 : index
    %c0_45 = arith.constant 0 : index
    %c0_46 = arith.constant 0 : index
    %139 = vector.load %arg6[%c0_44, %c0_45, %c0_46] : memref<1x1x128xf32, #tpu.memory_space<vmem>>, vector<1x1x128xf32>
    %140 = vector.shape_cast %139 : vector<1x1x128xf32> to vector<1x128xf32>
    %141 = vector.shape_cast %138 : vector<1x128xf32> to vector<1x1x128xf32>
    tpu.vector_store %arg6[%c0_44, %c0_45, %c0_46], %141 {strides = array<i32>} : memref<1x1x128xf32, #tpu.memory_space<vmem>>, vector<1x1x128xf32>,
    return
  }
  func.func @transform_0(%arg0: i32) -> (i32, i32, i32) {
    %c0_i32 = arith.constant 0 : i32
    %c0_i32_0 = arith.constant 0 : i32
    %c0_i32_1 = arith.constant 0 : i32
    return %arg0, %c0_i32, %c0_i32_0 : i32, i32, i32
  }
  func.func @transform_1(%arg0: i32) -> (i32, i32, i32) {
    %c0_i32 = arith.constant 0 : i32
    %c0_i32_0 = arith.constant 0 : i32
    %c0_i32_1 = arith.constant 0 : i32
    return %arg0, %c0_i32, %c0_i32_0 : i32, i32, i32
  }
  func.func @transform_2(%arg0: i32) -> (i32, i32, i32) {
    %c0_i32 = arith.constant 0 : i32
    %c0_i32_0 = arith.constant 0 : i32
    %c0_i32_1 = arith.constant 0 : i32
    return %arg0, %c0_i32, %c0_i32_0 : i32, i32, i32
  }
  func.func @transform_3(%arg0: i32) -> (i32, i32, i32) {
    %c0_i32 = arith.constant 0 : i32
    %c0_i32_0 = arith.constant 0 : i32
    %c0_i32_1 = arith.constant 0 : i32
    return %arg0, %c0_i32, %c0_i32_0 : i32, i32, i32
  }
  func.func @transform_4(%arg0: i32) -> (i32, i32, i32) {
    %c0_i32 = arith.constant 0 : i32
    %c0_i32_0 = arith.constant 0 : i32
    %c0_i32_1 = arith.constant 0 : i32
    return %arg0, %c0_i32, %c0_i32_0 : i32, i32, i32
  }
  func.func @transform_5(%arg0: i32) -> (i32, i32, i32) {
    %c0_i32 = arith.constant 0 : i32
    %c0_i32_0 = arith.constant 0 : i32
    %c0_i32_1 = arith.constant 0 : i32
    return %arg0, %c0_i32, %c0_i32_0 : i32, i32, i32
  }
}

</mosaic_0001>

<bundles_post_ra>
// kernel: tpu_custom_call.1
= control target key start
LH: loop header
LB: loop body
LE: loop exit
PB: predicated region body
PF: predicated region fallthrough
CT: control target
= control target key end

     0   :  { %10 = vsyncpa [#allocation3], 0  ;;  %s837_s0 = inlined_call_operand.vmem [shape: f32[4,1,16], index: 0, kind: input, shape index: {}]   ;;  %s838_s1 = inlined_call_operand.vmem [shape: f32[4,1,16], index: 1, kind: input, shape index: {}]   ;;  %s839_s2 = inlined_call_operand.vmem [shape: f32[4,16,1], index: 2, kind: input, shape index: {}]   ;;  %s840_s3 = inlined_call_operand.vmem [shape: f32[4,1,16], index: 3, kind: input, shape index: {}]   ;;  %s841_s4 = inlined_call_operand.vmem [shape: f32[4,16,1], index: 4, kind: input, shape index: {}]   ;;  %s842_s5 = inlined_call_operand.hbm [shape: f32[4,1,128], index: 5, kind: output, shape index: {}]  }
   0x1   :  { %12 = vsyncpa [#allocation3 + $0x1], 0  ;;  %s705_s18 = smov 0   ;;  %s707_s19 = smov 0  }
   0x2   :  { %s709_s20 = smov 0   ;;  %s711_s21 = smov 0  }
   0x3 LB: > { %s726_s22 = sadd.s32 4294967295, %s670_s21   ;;  %s539_s23 = sadd.s32 4294967294, %s670_s21   ;;  %s670_s21 = sphi %s711_s21, %s850_s21   ;;  %s666_s20 = sphi %s709_s20, %s849_s20   ;;  %s662_s19 = sphi %s707_s19, %s848_s19   ;;  %s658_s18 = sphi %s705_s18, %s847_s18  }
   0x4   : > { %s730_s24 = sadd.s32 1, %s670_s21   ;;  %s155_s25 = sadd.s32 1, %s666_s20 }
   0x5   : > { %s152_s26 = ssub.s32 %s670_s21, %s730_s24  ;;  %p165_p0 = scmp.ne.s32.totalorder %s666_s20, %s662_s19 }
   0x6   : > { %p153_p1 = scmp.eq.s32.totalorder %s152_s26, 0  ;;  %p166_p2 = scmp.eq.s32.totalorder %s726_s22, 3 }
   0x7   : > { %p171_p3 = scmp.ne.s32.totalorder %s662_s19, %s658_s18  ;;  %p172_p4 = scmp.eq.s32.totalorder %s539_s23, 3 }
   0x8   : > { %s741_s27 = scalar_select %p153_p1, %s666_s20, %s155_s25  }
   0x9   : > { %p743_p5 = por %p166_p2, %p165_p0  ;;  %p747_p6 = por %p172_p4, %p171_p3 }
   0xa   : > { %p542_p7 = scmp.ge.s32.totalorder %s670_s21, 1  ;;  %p224_p8 = scmp.lt.s32.totalorder %s670_s21, 5 }
   0xc   : > { %p225_p9 = pnand %p542_p7, %p224_p8 }
   0xd   : > { %p265_p10 = scmp.lt.s32.totalorder (!%p225_p9), %s726_s22, 3 }
   0xe   : > { %228 = sbr.rel (%p225_p9) target bundleno = 461 (0x1cd), region = 40 }
  0x13   : > { %v672_v0 = vmov 0   ;;  %s755_s30 = scalar_select %p265_p10, %s726_s22, 3  ;;  %vm294_vm0 = vcmask 122880   ;;  %v673_v14 = vmov 0.0   ;;  %v371_v17 = vlaneseq }
  0x14   : > { %600 = vset.pattern.permute.xlu0 %v672_v0  ;;  %601 = vset.pattern.permute.xlu1 %v672_v0  ;;  %vm378_vm6 = vcmask 130048   ;;  %vm387_vm10 = vcmask 7168  }
  0x15   : > { %s557_s6 = sshll.u32 %s755_s30, 4  ;;  %s278_s12 = scalar_lea.vmem %s840_s3, %s755_s30  ;;  %v372_v18 = vshrl.u32 %v371_v17, 7 }
  0x16   : > { %s275_s9 = scalar_lea.vmem %s839_s2, %s557_s6  ;;  %v288_v2 = vld [vmem:[%s278_s12] sm:$0x1]  ;;  %s267_s15 = scalar_lea.vmem %s837_s0, %s755_s30 }
  0x17   : > { %v286_v1 = vld [vmem:[%s275_s9] sm:$0xff]  ;;  %v334_v3 = vsel %vm294_vm0, %v288_v2, 0.0  ;;  %v287_v4 = vld [vmem:[%s275_s9 + $0x8] sm:$0xff]  ;;  %v304_v5 = vsub.f32 1.0, %v288_v2  ;;  %s270_s23 = scalar_lea.vmem %s838_s1, %s755_s30  ;;  %v373_v20 = vsub.s32 0, %v372_v18  ;;  %s283_s7 = scalar_lea.vmem %s841_s4, %s557_s6 }
  0x18   : > { %340 = vperm.xlu0 %600, %v286_v1   ;;  %335 = vadd.xlane.f32.xlu1 %v334_v3  ;;  %v284_v6 = vld [vmem:[%s267_s15] sm:$0x1]  ;;  %v290_v41 = vld [vmem:[%s283_s7 + $0x8] sm:$0xff]  ;;  %s263_s30 = sand.u32 1, %s662_s19   ;;  %s554_s6 = sshll.u32 %s726_s22, 4 }
  0x19   : > { %v300_v7 = vmul.f32 %v288_v2, %v284_v6  ;;  %v305_v8 = vmul.f32 %v304_v5, %v284_v6  ;;  %v309_v11 = vsub.f32 1.0, %v284_v6  ;;  %vm291_vm1 = vcmp.eq.f32.partialorder %v284_v6, %v288_v2  ;;  %v548_v19 = vld [vmem:[%s270_s23] ss:$0 sm:$0xff]  ;;  %s264_s8 = scalar_lea.vmem [#allocation2], %s263_s30  ;;  %s443_s12 = scalar_lea.hbm %s842_s5, %s554_s6 }
  0x1a   : > { %v547_v15 = vsel %vm291_vm1, 1.0, %v673_v14  ;;  %v374_v24 = vrot.slane %v304_v5, %v373_v20  ;;  %v289_v38 = vld [vmem:[%s283_s7] sm:$0xff]  ;;  %s445_s9 = sshll.u32 %s264_s8, 4  ;;  %s433_s13 = scalar_lea.sflag [#allocation3], %s263_s30  ;;  %s446_s9 = int_to_ptr.vmem [resolvable:$true] %s445_s9 }
  0x1b   : > { %v301_v9 = vsel %vm294_vm0, %v300_v7, 0.0  ;;  %v306_v10 = vsel %vm294_vm0, %v305_v8, 0.0  ;;  %v310_v12 = vmul.f32 %v309_v11, %v288_v2  ;;  %v295_v16 = vsel %vm294_vm0, %v547_v15, 0.0  ;;  %s610_s14 = scalar_lea.vmem %s446_s9, 16  ;;  %s674_s15 = smov [#allocation2]  }
  0x1c   : > { %345 = vperm.xlu0 %600, %v287_v4   ;;  %p611_p11 = scmp.ne.s32.totalorder %s446_s9, %s610_s14  ;;  %s614_s16 = sshll.u32 %s674_s15, 4  ;;  %s615_s16 = int_to_ptr.vmem [resolvable:$false] %s614_s16 }
  0x1d   : > { %v311_v13 = vsel %vm294_vm0, %v310_v12, 0.0  ;;  %s616_s22 = scalar_lea.vmem %s615_s16, 32  ;;  %p617_p0 = scmp.lt.s32.totalorder %s446_s9, %s615_s16 }
  0x1e   : > { %p612_p12 = pnand %p611_p11, %p743_p5  ;;  %p618_p1 = scmp.lt.s32.totalorder %s616_s22, %s610_s14 }
  0x20   : > { %p613_p13 = pneg %p612_p12  ;;  %p619_p2 = por %p618_p1, %p617_p0 }
  0x22   : > { %p620_p3 = pnand %p619_p2, %p613_p13 }
  0x93   : > { %v341_v21 = vpop.permute.xlu0 %340 }
  0x94   : > { %vm354_vm2 = vcmp.gt.f32.partialorder %v341_v21, %v548_v19  ;;  %vm360_vm3 = vcmp.eq.f32.partialorder %v341_v21, %v548_v19 }
  0x95   : > { %v551_v22 = vsel %vm360_vm3, 1.0, %v673_v14  ;;  %v549_v25 = vsel %vm354_vm2, 1.0, %v673_v14 }
  0x96   : > { %v366_v23 = vmul.f32 0.5, %v551_v22 }
  0x97   : > { %v346_v26 = vpop.permute.xlu0 %345 }
  0x98   : > { %v368_v27 = vadd.f32 %v549_v25, %v366_v23  ;;  %vm355_vm4 = vcmp.gt.f32.partialorder %v346_v26, %v548_v19  ;;  %vm361_vm5 = vcmp.eq.f32.partialorder %v346_v26, %v548_v19 }
  0x99   : > { %v552_v28 = vsel %vm361_vm5, 1.0, %v673_v14  ;;  %v550_v31 = vsel %vm355_vm4, 1.0, %v673_v14 }
  0x9a   : > { %v367_v29 = vmul.f32 0.5, %v552_v28  ;;  %v376_v30 = vmul.f32 %v374_v24, %v368_v27 }
  0x9c   : > { %v369_v32 = vadd.f32 %v550_v31, %v367_v29  ;;  %v379_v33 = vsel %vm378_vm6, %v376_v30, 0.0 }
  0x9d   : > { %380 = vadd.xlane.f32.xlu1 %v379_v33 }
  0x9e   : > { %v377_v34 = vmul.f32 %v374_v24, %v369_v32 }
  0xa0   : > { %v382_v35 = vsel %vm378_vm6, %v377_v34, 0.0 }
  0xa1   : > { %383 = vadd.xlane.f32.xlu0 %v382_v35  ;;  %302 = vadd.xlane.f32.xlu1 %v301_v9  ;;  %v336_v36 = vpop.xlane.xlu1 %335 }
  0xa2   : > { %v337_v37 = vsub.f32 16.0, %v336_v36  ;;  %vm397_vm7 = vcmp.gt.f32.partialorder %v336_v36, 0.0 }
  0xa4   : > { %vm398_vm8 = vcmp.gt.f32.partialorder %v337_v37, 0.0  ;;  %v400_v40 = vmul.f32 %v337_v37, %v336_v36 }
  0xa5   : > { %307 = vadd.xlane.f32.xlu1 %v306_v10  ;;  %vm791_vm9 = vmand %vm397_vm7, %vm398_vm8 }
  0xa6   : > { %v401_v46 = vsel %vm791_vm9, %v400_v40, 1.0 }
  0xa7   : > { %602 = vrcp.f32 %v401_v46 }
  0xa9   : > { %312 = vadd.xlane.f32.xlu1 %v311_v13 }
  0xad   : > { %296 = vadd.xlane.f32.xlu1 %v295_v16  ;;  %v406_v16 = vand.u32 127, %v371_v17  ;;  %v553_v17 = vsel %vm791_vm9, 1.0, %v673_v14 }
  0xaf   : > { %vm407_vm14 = vcmp.eq.s32.totalorder %v406_v16, 0  ;;  %vm409_vm15 = vcmp.eq.s32.totalorder %v406_v16, 1  ;;  %vm412_vm0 = vcmp.eq.s32.totalorder %v406_v16, 2  ;;  %vm415_vm1 = vcmp.eq.s32.totalorder %v406_v16, 3 }
  0xb0   : > { %vm418_vm2 = vcmp.eq.s32.totalorder %v406_v16, 4  ;;  %vm426_vm3 = vcmp.eq.s32.totalorder %v406_v16, 5 }
  0xb1   : > { %v429_v30 = vsel %vm426_vm3, %v553_v17, 0.0 }
  0xb4   : > { %v603_v56 = vpop.eup %602 }
 0x126   : > { %v381_v39 = vpop.xlane.xlu1 %380 }
 0x127   : > { %v385_v43 = vmul.f32 %v381_v39, %v289_v38 }
 0x129   : > { %v388_v47 = vsel %vm387_vm10, %v385_v43, 0.0 }
 0x12a   : > { %v384_v44 = vpop.xlane.xlu0 %383  ;;  %v303_v59 = vpop.xlane.xlu1 %302 }
 0x12b   : > { %v386_v45 = vmul.f32 %v384_v44, %v290_v41 }
 0x12d   : > { %v389_v48 = vsel %vm387_vm10, %v386_v45, 0.0 }
 0x12e   : > { %v390_v49 = vadd.f32 %v389_v48, %v388_v47  ;;  %v308_v60 = vpop.xlane.xlu1 %307 }
 0x12f   : > { %v314_v62 = vadd.f32 %v308_v60, %v303_v59 }
 0x130   : > { %v391_v50 = vrot.slane %v390_v49, 4 }
 0x131   : > { %vm315_vm11 = vcmp.gt.f32.partialorder %v314_v62, 0.0 }
 0x132   : > { %v392_v51 = vadd.f32 %v391_v50, %v390_v49  ;;  %v313_v61 = vpop.xlane.xlu1 %312  ;;  %v316_v0 = vsel %vm315_vm11, %v314_v62, 1.0 }
 0x133   : > { %v320_v63 = vadd.f32 %v313_v61, %v303_v59  ;;  %604 = vrcp.f32 %v316_v0 }
 0x134   : > { %v393_v52 = vrot.slane %v392_v51, 2 }
 0x135   : > { %vm321_vm12 = vcmp.gt.f32.partialorder %v320_v63, 0.0 }
 0x136   : > { %v394_v53 = vadd.f32 %v393_v52, %v392_v51  ;;  %v322_v1 = vsel %vm321_vm12, %v320_v63, 1.0  ;;  %v297_v15 = vpop.xlane.xlu1 %296 }
 0x137   : > { %606 = vrcp.f32 %v322_v1  ;;  %v299_v18 = vmul.f32 0.0625, %v297_v15 }
 0x138   : > { %v395_v54 = vrot.slane %v394_v53, 1 }
 0x139   : > { %v408_v21 = vsel %vm407_vm14, %v299_v18, 0.0 }
 0x13a   : > { %v396_v55 = vadd.f32 %v395_v54, %v394_v53 }
 0x13c   : > { %v403_v57 = vmul.f32 %v603_v56, %v396_v55 }
 0x13e   : > { %v404_v58 = vsel %vm791_vm9, %v403_v57, 0.0 }
 0x13f   : > { %421 = vperm.xlu1 %601, %v404_v58  }
 0x140   : > { %v605_v2 = vpop.eup %604 }
 0x141   : > { %v318_v4 = vmul.f32 %v605_v2, %v303_v59 }
 0x143   : > { %v319_v6 = vsel %vm315_vm11, %v318_v4, 0.0 }
 0x144   : > { %v607_v3 = vpop.eup %606  ;;  %v328_v10 = vmul.f32 2.0, %v319_v6  ;;  %v413_v23 = vsel %vm412_vm0, %v319_v6, 0.0 }
 0x145   : > { %v324_v5 = vmul.f32 %v607_v3, %v303_v59 }
 0x147   : > { %v325_v7 = vsel %vm321_vm12, %v324_v5, 0.0 }
 0x148   : > { %v326_v8 = vadd.f32 %v325_v7, %v319_v6  ;;  %v329_v11 = vmul.f32 %v328_v10, %v325_v7  ;;  %v416_v25 = vsel %vm415_vm1, %v325_v7, 0.0 }
 0x14a   : > { %vm327_vm13 = vcmp.gt.f32.partialorder %v326_v8, 0.0 }
 0x14b   : > { %v330_v9 = vsel %vm327_vm13, %v326_v8, 1.0 }
 0x14c   : > { %608 = vrcp.f32 %v330_v9 }
 0x159   : > { %v609_v12 = vpop.eup %608 }
 0x15a   : > { %v332_v13 = vmul.f32 %v609_v12, %v329_v11 }
 0x15c   : > { %v333_v19 = vsel %vm327_vm13, %v332_v13, 0.0 }
 0x15d   : > { %v410_v20 = vsel %vm409_vm15, %v333_v19, 0.0 }
 0x15e   : > { %v411_v22 = vadd.f32 %v410_v20, %v408_v21 }
 0x160   : > { %v414_v24 = vadd.f32 %v413_v23, %v411_v22 }
 0x162   : > { %v417_v26 = vadd.f32 %v416_v25, %v414_v24 }
 0x1ba   : > { %v422_v27 = vpop.permute.xlu1 %421 }
 0x1bb   : > { %v424_v28 = vsel %vm418_vm2, %v422_v27, 0.0 }
 0x1bc   : > { %v425_v29 = vadd.f32 %v424_v28, %v417_v26 }
 0x1be   : > { %v430_v31 = vadd.f32 %v429_v30, %v425_v29 }
 0x1c0   : > { %431 = vst [vmem:[%s264_s8] sm:$0x1] %v430_v31 }
 0x1c1   : > { %623 = shalt.err (!%p620_p3)
}
 0x1c2   : > { %s624_s17 = scalar_lea.hbm %s443_s12, 16  ;;  %s628_s26 = scalar_lea.hbm %s842_s5, 64 }
 0x1c3   : > { %p625_p4 = scmp.ne.s32.totalorder %s443_s12, %s624_s17  ;;  %p629_p9 = scmp.lt.s32.totalorder %s443_s12, %s842_s5 }
 0x1c4   : > { %p630_p10 = scmp.lt.s32.totalorder %s628_s26, %s624_s17 }
 0x1c5   : > { %p626_p7 = pnand %p625_p4, %p743_p5 }
 0x1c6   : > { %p631_p11 = por %p630_p10, %p629_p9 }
 0x1c7   : > { %p627_p8 = pneg %p626_p7 }
 0x1c9   : > { %p632_p12 = pnand %p631_p11, %p627_p8 }
 0x1cb   : > { %635 = shalt.err (!%p632_p12)
}
 0x1cc   : > { %559 = dma.vmem_to_hbm [thread:$0]  (%p743_p5), %s446_s9, 16, %s443_s12, %s433_s13  }
 0x1cd PF: > { %p565_p13 = scmp.ge.s32.totalorder %s670_s21, 2  ;;  %s457_s6 = sand.u32 1, %s658_s18  }
 0x1ce   : > { %s458_s8 = scalar_lea.sflag [#allocation3], %s457_s6 }
 0x1cf   : > { %p562_p0 = pnand %p565_p13, %p747_p6 }
 0x1d1   : > { %p563_p1 = pneg %p562_p0 }
 0x1d3   : > { %653 = dma.done.wait (%p563_p1), %s458_s8, 16  }
 0x1d4   : > { %655 = vsyncadd (%p563_p1), %s458_s8, 4294967280  ;;  %p15_p2 = scmp.ge.s32.totalorder %s730_s24, 6   ;;  %s847_s18 = smov %s662_s19 }
 0x1d5   : > { %s848_s19 = smov %s666_s20  ;;  %s849_s20 = smov %s741_s27 }
 0x1d6   : > { %s850_s21 = smov %s730_s24  ;;  %17 = sbr.rel (!%p15_p2) target bundleno = 3 (0x3), region = 87 }
 0x1db   :  { %462 = vsyncpa [#allocation3], 1 }
 0x1dc   :  { %464 = vsyncpa [#allocation3 + $0x1], 1 }

</bundles_post_ra>
